<compile_context>
chip_gen: v6e
topology: v6e:2x2x1
jax: 0.10.0
libtpu: 0.0.40
codegen_flags: <defaults>
</compile_context>

<pallas_src>
import numpy as np

import jax
import jax.numpy as jnp
from jax.experimental import pallas as pl
from jax.experimental.pallas import tpu as pltpu


def _rote_kernel(rel_blk_ref,          # SMEM scalar prefetch: (nb,) int32 relation id per block
                 w_ref, r_ref,         # VMEM (1, D, D): this block's W / R matrices
                 ph_ref, nh_ref,       # VMEM (TB, D): normalized pos / neg head embeddings
                 pt_ref, nt_ref,       # VMEM (TB, D): alpha-scaled normalized pos / neg tails
                 pos_ref, neg_ref):    # VMEM (1, 1, TB) outputs (lane-dense)
    del rel_blk_ref                    # only consumed by the index_maps
    w = w_ref[0]                       # (D, D), row-major: y = W @ x
    r = r_ref[0]                       # (D, D)
    dt = w.dtype
    # Contract last dims: out[n, k] = sum_d lhs[n, d] * rhs[k, d]  (== (RHS @ lhs_n)[k])
    dims = (((1,), (1,)), ((), ()))

    # Projections W @ x for all four roles, 128 rows per MXU pass.
    proj_ph = jax.lax.dot_general(ph_ref[...].astype(dt), w, dims,
                                  preferred_element_type=jnp.float32)
    proj_nh = jax.lax.dot_general(nh_ref[...].astype(dt), w, dims,
                                  preferred_element_type=jnp.float32)
    proj_pt = jax.lax.dot_general(pt_ref[...].astype(dt), w, dims,
                                  preferred_element_type=jnp.float32)   # == alpha * (W @ t_pos)
    proj_nt = jax.lax.dot_general(nt_ref[...].astype(dt), w, dims,
                                  preferred_element_type=jnp.float32)   # == alpha * (W @ t_neg)

    # Rotation R @ (W @ h): only the heads are rotated.
    rot_p = jax.lax.dot_general(proj_ph.astype(dt), r, dims,
                                preferred_element_type=jnp.float32)
    rot_n = jax.lax.dot_general(proj_nh.astype(dt), r, dims,
                                preferred_element_type=jnp.float32)

    diff_p = rot_p - proj_pt           # (TB, D)
    diff_n = rot_n - proj_nt

    # Sum-of-squares over D as a single MXU contraction: result is already
    # lane-major (1, TB) -> one unmasked lane-dense store per output block.
    ones_row = jnp.ones((1, diff_p.shape[-1]), jnp.float32)
    ssq_p = jax.lax.dot_general(ones_row, diff_p * diff_p, dims,
                                preferred_element_type=jnp.float32)     # (1, TB)
    ssq_n = jax.lax.dot_general(ones_row, diff_n * diff_n, dims,
                                preferred_element_type=jnp.float32)

    # TODO(synk): if a VJP is ever added, guard the padded (ssq == 0) slots before sqrt.
    pos_ref[...] = jnp.sqrt(ssq_p).reshape(pos_ref.shape)
    neg_ref[...] = jnp.sqrt(ssq_n).reshape(neg_ref.shape)


def rote_forward(entity_emb, R_k_s_emb, W_k_s_emb, alpha_emb,
                 pos_exmpls, neg_exmpls, margin, *,
                 block_triples=128, matrix_dtype=jnp.float32):
    """RotE forward. Returns (loss, pos_scores, neg_scores).

    matrix_dtype=jnp.bfloat16 halves W/R HBM + VMEM traffic on v6e/v7x (MXU still
    accumulates in f32); default float32 keeps the PyTorch-module numerics.
    """
    E, D = entity_emb.shape
    NR = R_k_s_emb.shape[0]
    B = pos_exmpls.shape[0]
    tb = int(block_triples)
    assert tb % 8 == 0, "block_triples must be a multiple of 8"

    # ---- host-side grouping: sort triples by relation and pad each relation group
    # to a multiple of TB so every grid block holds exactly one relation.
    # TODO(synk): for a fully jittable wrapper, replace this with a fixed-capacity
    #             (ceil(B/TB) + NR) * TB layout computed on-device.
    rel = np.asarray(pos_exmpls[:, 1]).astype(np.int32)            # (B,)
    order = np.argsort(rel, kind="stable")                         # original idx, sorted by rel
    sorted_rel = rel[order]
    counts = np.bincount(rel, minlength=NR)                        # (NR,)
    padded = ((counts + tb - 1) // tb) * tb                        # per-group size, multiple of TB
    dst_start = np.concatenate([[0], np.cumsum(padded)[:-1]])      # padded start of each group
    src_start = np.concatenate([[0], np.cumsum(counts)[:-1]])      # sorted start of each group
    Bp = max(int(padded.sum()), 2 * tb)   # >= 2 grid steps so v7x's 2nd TensorCore has work
    nb = Bp // tb

    rank = np.arange(B) - src_start[sorted_rel]
    dest = (dst_start[sorted_rel] + rank).astype(np.int32)         # padded slot of sorted triple s
    dest_of_orig = np.empty(B, np.int32)
    dest_of_orig[order] = dest                                     # padded slot of original triple b

    src_idx = np.zeros(Bp, np.int32)                               # padded slot -> original triple
    valid = np.zeros(Bp, np.float32)
    src_idx[dest] = order
    valid[dest] = 1.0

    rel_per_block = np.zeros(nb, np.int32)                         # relation id of each grid block
    for k in range(NR):
        s, c = int(dst_start[k] // tb), int(padded[k] // tb)
        rel_per_block[s:s + c] = k

    src_idx = jnp.asarray(src_idx)
    valid_col = jnp.asarray(valid)[:, None]
    dest_of_orig = jnp.asarray(dest_of_orig)
    rel_per_block = jnp.asarray(rel_per_block)

    # ---- device-side tensor prep ------------------------------------------------
    rel_j = jnp.asarray(rel)
    alpha = alpha_emb[rel_j, 0].astype(jnp.float32)                # (B,)

    def gather_norm(idx):
        rows = entity_emb[idx]
        # normalize only the gathered rows: O(B*D) instead of O(E*D)
        return rows / jnp.linalg.norm(rows, axis=-1, keepdims=True)

    ph = gather_norm(pos_exmpls[:, 0])
    nh = gather_norm(neg_exmpls[:, 0])
    # alpha * (W @ t) == W @ (alpha * t): fold alpha into the tails so the kernel
    # needs no per-triple scalars at all.
    pt = gather_norm(pos_exmpls[:, 2]) * alpha[:, None]
    nt = gather_norm(neg_exmpls[:, 2]) * alpha[:, None]

    def layout(x):                     # (B, D) -> (Bp, D) relation-blocked, zero padding
        return (x[src_idx] * valid_col).astype(jnp.float32)

    ph_p, nh_p, pt_p, nt_p = layout(ph), layout(nh), layout(pt), layout(nt)

    # Relation tables stay in HBM; each grid step auto-DMAs exactly one (D, D) W/R
    # pair via the data-dependent index_map, so the tables never need to fit VMEM.
    W_tab = W_k_s_emb.reshape(NR, D, D).astype(matrix_dtype)
    R_tab = R_k_s_emb.reshape(NR, D, D).astype(matrix_dtype)

    score_shape = jax.ShapeDtypeStruct((nb, 1, tb), jnp.float32)

    # VMEM budget per step (double-buffered inputs + outputs); raise the scoped
    # limit only when large D needs it (v5e default scoped VMEM is 16 MiB).
    mat_bytes = jnp.dtype(matrix_dtype).itemsize
    vmem_need = 2 * (2 * D * D * mat_bytes + 4 * tb * D * 4) + 4 * tb * 4
    cp = dict(dimension_semantics=("parallel",))
    if vmem_need > 12 * 2**20:
        cp["vmem_limit_bytes"] = min(int(2 * vmem_need), 100 * 2**20)

    pos_out, neg_out = pl.pallas_call(
        _rote_kernel,
        out_shape=(score_shape, score_shape),
        grid_spec=pltpu.PrefetchScalarGridSpec(
            num_scalar_prefetch=1,
            grid=(nb,),
            in_specs=[
                pl.BlockSpec((1, D, D), lambda i, relb: (relb[i], 0, 0)),   # W of this block
                pl.BlockSpec((1, D, D), lambda i, relb: (relb[i], 0, 0)),   # R of this block
                pl.BlockSpec((tb, D), lambda i, relb: (i, 0)),              # pos heads
                pl.BlockSpec((tb, D), lambda i, relb: (i, 0)),              # neg heads
                pl.BlockSpec((tb, D), lambda i, relb: (i, 0)),              # alpha * pos tails
                pl.BlockSpec((tb, D), lambda i, relb: (i, 0)),              # alpha * neg tails
            ],
            out_specs=(
                pl.BlockSpec((1, 1, tb), lambda i, relb: (i, 0, 0)),
                pl.BlockSpec((1, 1, tb), lambda i, relb: (i, 0, 0)),
            ),
        ),
        compiler_params=pltpu.CompilerParams(**cp),
    )(rel_per_block, W_tab, R_tab, ph_p, nh_p, pt_p, nt_p)

    pos_scores = pos_out.reshape(Bp)[dest_of_orig]
    neg_scores = neg_out.reshape(Bp)[dest_of_orig]
    # Margin ranking loss (y = -1): mean(max(0, pos - neg + margin)) — cheap, done in
    # plain JAX so the kernel's batch axis stays fully parallel.
    loss = jnp.mean(jnp.maximum(pos_scores - neg_scores + margin, 0.0))
    return loss, pos_scores, neg_scores


def _reference(entity_emb, R_k_s_emb, W_k_s_emb, alpha_emb,
               pos_exmpls, neg_exmpls, margin):
    E, D = entity_emb.shape
    ent = entity_emb / jnp.linalg.norm(entity_emb, axis=1, keepdims=True)
    B = pos_exmpls.shape[0]
    rel = pos_exmpls[:, 1]
    R = R_k_s_emb[rel].reshape(B, D, D)
    W = W_k_s_emb[rel].reshape(B, D, D)
    a = alpha_emb[rel].reshape(B, 1)

    def score(h, t):
        proj_h = jnp.einsum('bij,bj->bi', W, h)
        proj_t = jnp.einsum('bij,bj->bi', W, t)
        rot_h = jnp.einsum('bij,bj->bi', R, proj_h)
        diff = rot_h - a * proj_t
        return jnp.sqrt(jnp.sum(diff * diff, axis=-1))

    pos = score(ent[pos_exmpls[:, 0]], ent[pos_exmpls[:, 2]])
    neg = score(ent[neg_exmpls[:, 0]], ent[neg_exmpls[:, 2]])
    loss = jnp.mean(jnp.maximum(pos - neg + margin, 0.0))
    return loss, pos, neg


if __name__ == "__main__":
    num_entities = 64
    num_relations = 4
    embedding_dim = 32       # D
    batch = 512              # B
    margin = 1.0

    key = jax.random.PRNGKey(0)
    k_ent, k_R, k_W, k_a, k_pos, k_neg = jax.random.split(key, 6)

    bound = 6.0 / np.sqrt(embedding_dim)
    entity_emb = jax.random.uniform(
        k_ent, (num_entities, embedding_dim), jnp.float32, -bound, bound)
    # nn.Embedding default init is N(0, 1)
    R_k_s_emb = jax.random.normal(
        k_R, (num_relations, embedding_dim * embedding_dim), jnp.float32)
    W_k_s_emb = jax.random.normal(
        k_W, (num_relations, embedding_dim * embedding_dim), jnp.float32)
    alpha_emb = jax.random.normal(k_a, (num_relations, 1), jnp.float32)

    pos_exmpls = jnp.stack([
        jax.random.randint(jax.random.fold_in(k_pos, 0), (batch,), 0, num_entities),
        jax.random.randint(jax.random.fold_in(k_pos, 1), (batch,), 0, num_relations),
        jax.random.randint(jax.random.fold_in(k_pos, 2), (batch,), 0, num_entities),
    ], axis=1).astype(jnp.int32)
    neg_exmpls = jnp.stack([
        jax.random.randint(jax.random.fold_in(k_neg, 0), (batch,), 0, num_entities),
        pos_exmpls[:, 1],
        jax.random.randint(jax.random.fold_in(k_neg, 2), (batch,), 0, num_entities),
    ], axis=1).astype(jnp.int32)

    loss, pos_s, neg_s = rote_forward(
        entity_emb, R_k_s_emb, W_k_s_emb, alpha_emb, pos_exmpls, neg_exmpls, margin,
        block_triples=128)
    jax.block_until_ready((loss, pos_s, neg_s))

    ref_loss, ref_pos, ref_neg = _reference(
        entity_emb, R_k_s_emb, W_k_s_emb, alpha_emb, pos_exmpls, neg_exmpls, margin)

    np.testing.assert_allclose(np.asarray(pos_s), np.asarray(ref_pos), rtol=1e-4, atol=1e-3)
    np.testing.assert_allclose(np.asarray(neg_s), np.asarray(ref_neg), rtol=1e-4, atol=1e-3)
    np.testing.assert_allclose(np.asarray(loss), np.asarray(ref_loss), rtol=1e-4, atol=1e-3)

    print("KERNEL_OK")
</pallas_src>

<mosaic_0001>
module attributes {stable_mosaic.version = 11 : i64} {
  func.func @_rote_kernel(%arg0: i32, %arg1: memref<7xi32, #tpu.memory_space<smem>>, %arg2: memref<1x32x32xf32, #tpu.memory_space<vmem>>, %arg3: memref<1x32x32xf32, #tpu.memory_space<vmem>>, %arg4: memref<128x32xf32, #tpu.memory_space<vmem>>, %arg5: memref<128x32xf32, #tpu.memory_space<vmem>>, %arg6: memref<128x32xf32, #tpu.memory_space<vmem>>, %arg7: memref<128x32xf32, #tpu.memory_space<vmem>>, %arg8: memref<1x1x128xf32, #tpu.memory_space<vmem>>, %arg9: memref<1x1x128xf32, #tpu.memory_space<vmem>>) attributes {dimension_semantics = [#tpu.dimension_semantics<parallel>], iteration_bounds = array<i64: 7>, scalar_prefetch = 1 : i64, scratch_operands = 0 : i64, tpu.core_type = #tpu.core_type<tc>, window_params = [{transform_indices = @transform_0, window_bounds = array<i64: 1, 32, 32>}, {transform_indices = @transform_1, window_bounds = array<i64: 1, 32, 32>}, {transform_indices = @transform_2, window_bounds = array<i64: 128, 32>}, {transform_indices = @transform_3, window_bounds = array<i64: 128, 32>}, {transform_indices = @transform_4, window_bounds = array<i64: 128, 32>}, {transform_indices = @transform_5, window_bounds = array<i64: 128, 32>}, {transform_indices = @transform_6, window_bounds = array<i64: 1, 1, 128>}, {transform_indices = @transform_7, window_bounds = array<i64: 1, 1, 128>}]} {
    %c0 = arith.constant 0 : index
    %c0_0 = arith.constant 0 : index
    %c0_1 = arith.constant 0 : index
    %0 = vector.load %arg2[%c0, %c0_0, %c0_1] : memref<1x32x32xf32, #tpu.memory_space<vmem>>, vector<1x32x32xf32>
    %1 = vector.shape_cast %0 : vector<1x32x32xf32> to vector<32x32xf32>
    %c0_2 = arith.constant 0 : index
    %c0_3 = arith.constant 0 : index
    %c0_4 = arith.constant 0 : index
    %2 = vector.load %arg3[%c0_2, %c0_3, %c0_4] : memref<1x32x32xf32, #tpu.memory_space<vmem>>, vector<1x32x32xf32>
    %3 = vector.shape_cast %2 : vector<1x32x32xf32> to vector<32x32xf32>
    %c0_5 = arith.constant 0 : index
    %c0_6 = arith.constant 0 : index
    %4 = vector.load %arg4[%c0_5, %c0_6] : memref<128x32xf32, #tpu.memory_space<vmem>>, vector<128x32xf32>
    %cst = arith.constant dense<0.000000e+00> : vector<128x32xf32>
    %5 = tpu.matmul %4, %1, %cst {dimension_numbers = #tpu.dot_dimension_numbers<[1], [1], [0], [0], [0, 0, 1, 0], [], []>} : vector<128x32xf32>, vector<32x32xf32>, vector<128x32xf32> -> vector<128x32xf32>
    %c0_7 = arith.constant 0 : index
    %c0_8 = arith.constant 0 : index
    %6 = vector.load %arg5[%c0_7, %c0_8] : memref<128x32xf32, #tpu.memory_space<vmem>>, vector<128x32xf32>
    %cst_9 = arith.constant dense<0.000000e+00> : vector<128x32xf32>
    %7 = tpu.matmul %6, %1, %cst_9 {dimension_numbers = #tpu.dot_dimension_numbers<[1], [1], [0], [0], [0, 0, 1, 0], [], []>} : vector<128x32xf32>, vector<32x32xf32>, vector<128x32xf32> -> vector<128x32xf32>
    %c0_10 = arith.constant 0 : index
    %c0_11 = arith.constant 0 : index
    %8 = vector.load %arg6[%c0_10, %c0_11] : memref<128x32xf32, #tpu.memory_space<vmem>>, vector<128x32xf32>
    %cst_12 = arith.constant dense<0.000000e+00> : vector<128x32xf32>
    %9 = tpu.matmul %8, %1, %cst_12 {dimension_numbers = #tpu.dot_dimension_numbers<[1], [1], [0], [0], [0, 0, 1, 0], [], []>} : vector<128x32xf32>, vector<32x32xf32>, vector<128x32xf32> -> vector<128x32xf32>
    %c0_13 = arith.constant 0 : index
    %c0_14 = arith.constant 0 : index
    %10 = vector.load %arg7[%c0_13, %c0_14] : memref<128x32xf32, #tpu.memory_space<vmem>>, vector<128x32xf32>
    %cst_15 = arith.constant dense<0.000000e+00> : vector<128x32xf32>
    %11 = tpu.matmul %10, %1, %cst_15 {dimension_numbers = #tpu.dot_dimension_numbers<[1], [1], [0], [0], [0, 0, 1, 0], [], []>} : vector<128x32xf32>, vector<32x32xf32>, vector<128x32xf32> -> vector<128x32xf32>
    %cst_16 = arith.constant dense<0.000000e+00> : vector<128x32xf32>
    %12 = tpu.matmul %5, %3, %cst_16 {dimension_numbers = #tpu.dot_dimension_numbers<[1], [1], [0], [0], [0, 0, 1, 0], [], []>} : vector<128x32xf32>, vector<32x32xf32>, vector<128x32xf32> -> vector<128x32xf32>
    %cst_17 = arith.constant dense<0.000000e+00> : vector<128x32xf32>
    %13 = tpu.matmul %7, %3, %cst_17 {dimension_numbers = #tpu.dot_dimension_numbers<[1], [1], [0], [0], [0, 0, 1, 0], [], []>} : vector<128x32xf32>, vector<32x32xf32>, vector<128x32xf32> -> vector<128x32xf32>
    %14 = arith.subf %12, %9 : vector<128x32xf32>
    %15 = arith.subf %13, %11 : vector<128x32xf32>
    %cst_18 = arith.constant 1.000000e+00 : f32
    %16 = vector.broadcast %cst_18 : f32 to vector<1x32xf32>
    %17 = arith.mulf %14, %14 : vector<128x32xf32>
    %cst_19 = arith.constant dense<0.000000e+00> : vector<1x128xf32>
    %18 = tpu.matmul %16, %17, %cst_19 {dimension_numbers = #tpu.dot_dimension_numbers<[1], [1], [0], [0], [0, 0, 1, 0], [], []>} : vector<1x32xf32>, vector<128x32xf32>, vector<1x128xf32> -> vector<1x128xf32>
    %19 = arith.mulf %15, %15 : vector<128x32xf32>
    %cst_20 = arith.constant dense<0.000000e+00> : vector<1x128xf32>
    %20 = tpu.matmul %16, %19, %cst_20 {dimension_numbers = #tpu.dot_dimension_numbers<[1], [1], [0], [0], [0, 0, 1, 0], [], []>} : vector<1x32xf32>, vector<128x32xf32>, vector<1x128xf32> -> vector<1x128xf32>
    %21 = math.sqrt %18 : vector<1x128xf32>
    %22 = vector.shape_cast %21 : vector<1x128xf32> to vector<1x1x128xf32>
    %c0_21 = arith.constant 0 : index
    %c0_22 = arith.constant 0 : index
    %c0_23 = arith.constant 0 : index
    %23 = vector.load %arg8[%c0_21, %c0_22, %c0_23] : memref<1x1x128xf32, #tpu.memory_space<vmem>>, vector<1x1x128xf32>
    tpu.vector_store %arg8[%c0_21, %c0_22, %c0_23], %22 {strides = array<i32>} : memref<1x1x128xf32, #tpu.memory_space<vmem>>, vector<1x1x128xf32>,
    %24 = math.sqrt %20 : vector<1x128xf32>
    %25 = vector.shape_cast %24 : vector<1x128xf32> to vector<1x1x128xf32>
    %c0_24 = arith.constant 0 : index
    %c0_25 = arith.constant 0 : index
    %c0_26 = arith.constant 0 : index
    %26 = vector.load %arg9[%c0_24, %c0_25, %c0_26] : memref<1x1x128xf32, #tpu.memory_space<vmem>>, vector<1x1x128xf32>
    tpu.vector_store %arg9[%c0_24, %c0_25, %c0_26], %25 {strides = array<i32>} : memref<1x1x128xf32, #tpu.memory_space<vmem>>, vector<1x1x128xf32>,
    return
  }
  func.func @transform_0(%arg0: i32, %arg1: memref<7xi32, #tpu.memory_space<smem>>) -> (i32, i32, i32) {
    %0 = arith.index_cast %arg0 : i32 to index
    %1 = memref.load %arg1[%0] : memref<7xi32, #tpu.memory_space<smem>>
    %c0_i32 = arith.constant 0 : i32
    %c0_i32_0 = arith.constant 0 : i32
    %c0_i32_1 = arith.constant 0 : i32
    return %1, %c0_i32, %c0_i32_0 : i32, i32, i32
  }
  func.func @transform_1(%arg0: i32, %arg1: memref<7xi32, #tpu.memory_space<smem>>) -> (i32, i32, i32) {
    %0 = arith.index_cast %arg0 : i32 to index
    %1 = memref.load %arg1[%0] : memref<7xi32, #tpu.memory_space<smem>>
    %c0_i32 = arith.constant 0 : i32
    %c0_i32_0 = arith.constant 0 : i32
    %c0_i32_1 = arith.constant 0 : i32
    return %1, %c0_i32, %c0_i32_0 : i32, i32, i32
  }
  func.func @transform_2(%arg0: i32, %arg1: memref<7xi32, #tpu.memory_space<smem>>) -> (i32, i32) {
    %c0_i32 = arith.constant 0 : i32
    %c0_i32_0 = arith.constant 0 : i32
    return %arg0, %c0_i32 : i32, i32
  }
  func.func @transform_3(%arg0: i32, %arg1: memref<7xi32, #tpu.memory_space<smem>>) -> (i32, i32) {
    %c0_i32 = arith.constant 0 : i32
    %c0_i32_0 = arith.constant 0 : i32
    return %arg0, %c0_i32 : i32, i32
  }
  func.func @transform_4(%arg0: i32, %arg1: memref<7xi32, #tpu.memory_space<smem>>) -> (i32, i32) {
    %c0_i32 = arith.constant 0 : i32
    %c0_i32_0 = arith.constant 0 : i32
    return %arg0, %c0_i32 : i32, i32
  }
  func.func @transform_5(%arg0: i32, %arg1: memref<7xi32, #tpu.memory_space<smem>>) -> (i32, i32) {
    %c0_i32 = arith.constant 0 : i32
    %c0_i32_0 = arith.constant 0 : i32
    return %arg0, %c0_i32 : i32, i32
  }
  func.func @transform_6(%arg0: i32, %arg1: memref<7xi32, #tpu.memory_space<smem>>) -> (i32, i32, i32) {
    %c0_i32 = arith.constant 0 : i32
    %c0_i32_0 = arith.constant 0 : i32
    %c0_i32_1 = arith.constant 0 : i32
    return %arg0, %c0_i32, %c0_i32_0 : i32, i32, i32
  }
  func.func @transform_7(%arg0: i32, %arg1: memref<7xi32, #tpu.memory_space<smem>>) -> (i32, i32, i32) {
    %c0_i32 = arith.constant 0 : i32
    %c0_i32_0 = arith.constant 0 : i32
    %c0_i32_1 = arith.constant 0 : i32
    return %arg0, %c0_i32, %c0_i32_0 : i32, i32, i32
  }
}

</mosaic_0001>

<bundles_post_ra>
// kernel: tpu_custom_call.1
= control target key start
LH: loop header
LB: loop body
LE: loop exit
PB: predicated region body
PF: predicated region fallthrough
CT: control target
= control target key end

     0   :  { %s3555_s0 = inlined_call_operand.vmem [shape: s32[7], index: 0, kind: input, shape index: {}]   ;;  %s3556_s1 = inlined_call_operand.vmem [shape: f32[4,32,32], index: 1, kind: input, shape index: {}]   ;;  %s3557_s2 = inlined_call_operand.vmem [shape: f32[4,32,32], index: 2, kind: input, shape index: {}]   ;;  %s3558_s3 = inlined_call_operand.vmem [shape: f32[896,32], index: 3, kind: input, shape index: {}]   ;;  %s3559_s4 = inlined_call_operand.vmem [shape: f32[896,32], index: 4, kind: input, shape index: {}]   ;;  %s3560_s5 = inlined_call_operand.vmem [shape: f32[896,32], index: 5, kind: input, shape index: {}]   ;;  %s3561_s6 = inlined_call_operand.vmem [shape: f32[896,32], index: 6, kind: input, shape index: {}]   ;;  %s3562_s7 = inlined_call_operand.hbm [shape: f32[7,1,128], index: 7, kind: output, shape index: {0}]   ;;  %s3563_s8 = inlined_call_operand.hbm [shape: f32[7,1,128], index: 8, kind: output, shape index: {1}]  }
   0x1   :  { %s14_s29 = sshll.u32 %s3555_s0, 4  ;;  %s15_s29 = int_to_ptr.vmem [resolvable:$true] %s14_s29 }
   0x2   :  { %s2806_s30 = scalar_lea.vmem %s15_s29, 16  ;;  %p2811_p1 = scmp.lt.s32.totalorder %s15_s29, %s15_s29 }
   0x3   :  { %p2807_p0 = scmp.ne.s32.totalorder %s15_s29, %s2806_s30  ;;  %p2812_p2 = scmp.lt.s32.totalorder %s2806_s30, %s2806_s30 }
   0x5   :  { %p2813_p3 = por %p2812_p2, %p2811_p1 }
   0x7   :  { %p2814_p4 = pnand %p2813_p3, %p2807_p0 }
   0x9   :  { %2817 = shalt.err (!%p2814_p4)  }
   0xa   :  { %s2912_s9 = smov [#allocation3]  }
   0xb   :  { %17 = dma.vmem_to_smem %s15_s29, 16, %s2912_s9, [#allocation2] }
   0xc   :  { %2886 = dma.done.wait [#allocation2], 16 }
   0xd   :  { %2887 = vsyncadd [#allocation2], 4294967280 }
   0xe   :  { %19 = sfence }
   0xf   :  { %20 = vsyncpa [#allocation5], 0 }
  0x10   :  { %22 = vsyncpa [#allocation5 + $0x1], 0 }
  0x11   :  { %23 = vsyncpa [#allocation7], 0 }
  0x12   :  { %25 = vsyncpa [#allocation7 + $0x1], 0  ;;  %s2966_s10 = smov 0   ;;  %s2968_s0 = smov 0  }
  0x13   :  { %s2970_s11 = smov 0   ;;  %s2972_s12 = smov 0  }
  0x14 LB: > { %s2987_s13 = sadd.s32 4294967295, %s2910_s12   ;;  %s2162_s14 = sadd.s32 4294967294, %s2910_s12   ;;  %s2910_s12 = sphi %s2972_s12, %s3596_s12   ;;  %s2906_s11 = sphi %s2970_s11, %s3595_s11   ;;  %s2902_s0 = sphi %s2968_s0, %s3594_s0   ;;  %s2898_s10 = sphi %s2966_s10, %s3593_s10  }
  0x15   : > { %s2991_s15 = sadd.s32 1, %s2910_s12   ;;  %s198_s16 = sadd.s32 1, %s2906_s11 }
  0x16   : > { %s195_s17 = ssub.s32 %s2910_s12, %s2991_s15  ;;  %p208_p5 = scmp.ne.s32.totalorder %s2906_s11, %s2902_s0 }
  0x17   : > { %p196_p6 = scmp.eq.s32.totalorder %s195_s17, 0  ;;  %p209_p7 = scmp.eq.s32.totalorder %s2987_s13, 6 }
  0x18   : > { %p214_p8 = scmp.ne.s32.totalorder %s2902_s0, %s2898_s10  ;;  %p215_p9 = scmp.eq.s32.totalorder %s2162_s14, 6 }
  0x19   : > { %s3002_s18 = scalar_select %p196_p6, %s2906_s11, %s198_s16  }
  0x1a   : > { %p3004_p10 = por %p209_p7, %p208_p5  ;;  %p3008_p11 = por %p215_p9, %p214_p8 }
  0x1b   : > { %p2165_p12 = scmp.ge.s32.totalorder %s2910_s12, 1  ;;  %p315_p13 = scmp.lt.s32.totalorder %s2910_s12, 8 }
  0x1d   : > { %p316_p0 = pnand %p2165_p12, %p315_p13 }
  0x1f   : > { %319 = sbr.rel (%p316_p0) target bundleno = 794 (0x31a), region = 44 }
  0x24   : > { %s377_s21 = sld [smem:[#allocation3 + %s2987_s13]]  ;;  %s3016_s22 = sshll.u32 %s2987_s13, 4  ;;  %vm439_vm0 = vcmask 261120   ;;  %vm2914_vm1 = vmmov 0  }
  0x25   : > { %p392_p1 = scmp.lt.s32.totalorder %s3016_s22, 111 }
  0x27   : > { %s393_s23 = scalar_select %p392_p1, %s3016_s22, 111 }
  0x29   : > { %s3020_s24 = sshll.u32 %s393_s23, 3 }
  0x2a   : > { %p378_p2 = scmp.lt.s32.totalorder %s377_s21, 3  ;;  %s3026_s27 = scalar_lea.vmem %s3558_s3, %s3020_s24 }
  0x2b   : > { %v423_v0 = vld [vmem:[%s3026_s27] sm:$0xff]  ;;  %s3033_s30 = scalar_lea.vmem %s3559_s4, %s3020_s24  ;;  %v424_v6 = vld [vmem:[%s3026_s27 + $0x8] sm:$0xff]  ;;  %v425_v8 = vld [vmem:[%s3026_s27 + $0x10] sm:$0xff] }
  0x2c   : > { %s3598_s21 = smov (!%p378_p2, %s377_s21), 3  ;;  %2500 = vmatprep.mubr.msk.f32.mxu0 %vm439_vm0, %v423_v0  ;;  %v645_v1 = vld [vmem:[%s3033_s30] sm:$0xff]  ;;  %v646_v7 = vld [vmem:[%s3033_s30 + $0x8] sm:$0xff]  ;;  %v647_v9 = vld [vmem:[%s3033_s30 + $0x10] sm:$0xff] }
  0x2d   : > { %2532 = vmatprep.mubr.msk.f32.mxu1 %vm439_vm0, %v645_v1  ;;  %s2336_s9 = sshll.u32 %s3598_s21, 5  ;;  %s384_s21 = sld [smem:[#allocation3 + %s2987_s13]]  ;;  %v426_v10 = vld [vmem:[%s3026_s27 + $0x18] sm:$0xff]  ;;  %v427_v12 = vld [vmem:[%s3026_s27 + $0x20] sm:$0xff]  ;;  %v428_v14 = vld [vmem:[%s3026_s27 + $0x28] sm:$0xff] }
  0x2e   : > { %s382_s17 = scalar_lea.vmem %s3556_s1, %s2336_s9  ;;  %v648_v11 = vld [vmem:[%s3033_s30 + $0x18] sm:$0xff]  ;;  %v649_v13 = vld [vmem:[%s3033_s30 + $0x20] sm:$0xff]  ;;  %v650_v15 = vld [vmem:[%s3033_s30 + $0x28] sm:$0xff]  ;;  %s3148_s9 = scalar_lea.vmem %s3560_s5, %s3020_s24 }
  0x2f   : > { %v418_v2 = vld [vmem:[%s382_s17 + $0x18] sm:$0xff]  ;;  %v417_v3 = vld [vmem:[%s382_s17 + $0x10] sm:$0xff]  ;;  %v416_v4 = vld [vmem:[%s382_s17 + $0x8] sm:$0xff] }
  0x30   : > { %2492 = vmatprep.subr.msk.mxu0 %vm439_vm0, %v418_v2  ;;  %2524 = vmatprep.subr.msk.mxu1 %vm439_vm0, %v418_v2  ;;  %v3052_v5 = vld [vmem:[%s382_s17] sm:$0xff]  ;;  %v429_v16 = vld [vmem:[%s3026_s27 + $0x30] sm:$0xff]  ;;  %v430_v18 = vld [vmem:[%s3026_s27 + $0x38] sm:$0xff]  ;;  %s3154_s17 = scalar_lea.vmem %s3561_s6, %s3020_s24  ;;  %s3472_s24 = sand.u32 1, %s2902_s0  }
  0x31   : > { %2493 = vmatpush3.xpose.msk.msra.mxu0 %vm439_vm0, %v418_v2  ;;  %2525 = vmatpush3.xpose.msk.msra.mxu1 %vm439_vm0, %v418_v2  ;;  %v651_v17 = vld [vmem:[%s3033_s30 + $0x30] sm:$0xff]  ;;  %v652_v19 = vld [vmem:[%s3033_s30 + $0x38] sm:$0xff]  ;;  %v431_v20 = vld [vmem:[%s3026_s27 + $0x40] sm:$0xff]  ;;  %s1990_s14 = scalar_lea.sflag [#allocation5], %s3472_s24 }
  0x32   : > { %2494 = vmatprep.subr.msk.mxu0 %vm439_vm0, %v417_v3  ;;  %2526 = vmatprep.subr.msk.mxu1 %vm439_vm0, %v417_v3  ;;  %v653_v21 = vld [vmem:[%s3033_s30 + $0x40] sm:$0xff]  ;;  %v432_v23 = vld [vmem:[%s3026_s27 + $0x48] sm:$0xff]  ;;  %v433_v25 = vld [vmem:[%s3026_s27 + $0x50] sm:$0xff] }
  0x33   : > { %p385_p3 = scmp.lt.s32.totalorder %s384_s21, 3  ;;  %v654_v24 = vld [vmem:[%s3033_s30 + $0x48] sm:$0xff]  ;;  %v655_v26 = vld [vmem:[%s3033_s30 + $0x50] sm:$0xff]  ;;  %v434_v27 = vld [vmem:[%s3026_s27 + $0x58] sm:$0xff] }
  0x34   : > { %v656_v28 = vld [vmem:[%s3033_s30 + $0x58] sm:$0xff]  ;;  %v435_v29 = vld [vmem:[%s3026_s27 + $0x60] sm:$0xff]  ;;  %v436_v31 = vld [vmem:[%s3026_s27 + $0x68] sm:$0xff] }
  0x35   : > { %2495 = vmatpush3.xpose.msk.msra.mxu0 %vm439_vm0, %v417_v3  ;;  %2527 = vmatpush3.xpose.msk.msra.mxu1 %vm439_vm0, %v417_v3  ;;  %s3600_s21 = smov (!%p385_p3, %s384_s21), 3  ;;  %v657_v30 = vld [vmem:[%s3033_s30 + $0x60] sm:$0xff]  ;;  %v658_v32 = vld [vmem:[%s3033_s30 + $0x68] sm:$0xff]  ;;  %v437_v33 = vld [vmem:[%s3026_s27 + $0x70] sm:$0xff] }
  0x36   : > { %2496 = vmatprep.subr.msk.mxu0 %vm439_vm0, %v416_v4  ;;  %2528 = vmatprep.subr.msk.mxu1 %vm439_vm0, %v416_v4  ;;  %s2337_s13 = sshll.u32 %s3600_s21, 5  ;;  %v659_v34 = vld [vmem:[%s3033_s30 + $0x70] sm:$0xff]  ;;  %v438_v35 = vld [vmem:[%s3026_s27 + $0x78] sm:$0xff]  ;;  %v854_v37 = vld [vmem:[%s3148_s9] sm:$0xff]  ;;  %s370_s27 = scalar_lea.vmem [#allocation4], %s3472_s24 }
  0x37   : > { %s3103_s26 = scalar_lea.vmem %s3557_s2, %s2337_s13  ;;  %v660_v36 = vld [vmem:[%s3033_s30 + $0x78] sm:$0xff]  ;;  %v1063_v38 = vld [vmem:[%s3154_s17] sm:$0xff]  ;;  %v855_v39 = vld [vmem:[%s3148_s9 + $0x8] sm:$0xff]  ;;  %s2006_s30 = sshll.u32 %s370_s27, 4  ;;  %s3484_s30 = int_to_ptr.vmem [resolvable:$true] %s2006_s30 }
  0x38   : > { %v422_v22 = vld [vmem:[%s3103_s26 + $0x18] sm:$0xff]  ;;  %v1064_v40 = vld [vmem:[%s3154_s17 + $0x8] sm:$0xff]  ;;  %v856_v41 = vld [vmem:[%s3148_s9 + $0x10] sm:$0xff]  ;;  %s3566_s21 = scalar_lea.vmem [#allocation6], %s3472_s24  ;;  %s2818_s16 = scalar_lea.vmem %s3484_s30, 16 }
  0x39   : > { %2497 = vmatpush3.xpose.msk.msra.mxu0 %vm439_vm0, %v416_v4  ;;  %2529 = vmatpush3.xpose.msk.msra.mxu1 %vm439_vm0, %v416_v4  ;;  %v1065_v42 = vld [vmem:[%s3154_s17 + $0x10] sm:$0xff]  ;;  %v857_v44 = vld [vmem:[%s3148_s9 + $0x18] sm:$0xff]  ;;  %v858_v46 = vld [vmem:[%s3148_s9 + $0x20] sm:$0xff]  ;;  %s2019_s13 = sshll.u32 %s3566_s21, 4  ;;  %p2819_p4 = scmp.ne.s32.totalorder %s3484_s30, %s2818_s16  ;;  %s3492_s13 = int_to_ptr.vmem [resolvable:$true] %s2019_s13 }
  0x3a   : > { %2498 = vmatprep.subr.msk.mxu0 %vm439_vm0, %v3052_v5  ;;  %2530 = vmatprep.subr.msk.mxu1 %vm439_vm0, %v3052_v5  ;;  %v421_v43 = vld [vmem:[%s3103_s26 + $0x10] sm:$0xff]  ;;  %v1066_v45 = vld [vmem:[%s3154_s17 + $0x18] sm:$0xff]  ;;  %v1067_v47 = vld [vmem:[%s3154_s17 + $0x20] sm:$0xff] }
  0x3b   : > { %v420_v48 = vld [vmem:[%s3103_s26 + $0x8] sm:$0xff]  ;;  %v860_v51 = vld [vmem:[%s3148_s9 + $0x30] sm:$0xff]  ;;  %v419_v53 = vld [vmem:[%s3103_s26] sm:$0xff]  ;;  %s3482_s26 = scalar_lea.hbm %s3562_s7, %s3016_s22  ;;  %p2820_p5 = pnand %p2819_p4, %p3004_p10 }
  0x3c   : > { %v859_v49 = vld [vmem:[%s3148_s9 + $0x28] sm:$0xff]  ;;  %v1069_v52 = vld [vmem:[%s3154_s17 + $0x30] sm:$0xff]  ;;  %v861_v54 = vld [vmem:[%s3148_s9 + $0x38] sm:$0xff] }
  0x3d   : > { %2499 = vmatpush3.xpose.msk.msra.mxu0 %vm439_vm0, %v3052_v5  ;;  %2531 = vmatpush3.xpose.msk.msra.mxu1 %vm439_vm0, %v3052_v5  ;;  %v1068_v50 = vld [vmem:[%s3154_s17 + $0x28] sm:$0xff]  ;;  %v1070_v55 = vld [vmem:[%s3154_s17 + $0x38] sm:$0xff]  ;;  %v862_v56 = vld [vmem:[%s3148_s9 + $0x40] sm:$0xff]  ;;  %p2821_p6 = pneg %p2820_p5 }
  0x3e   : > { %2556 = vmatprep.subr.msk.mxu0 %vm439_vm0, %v418_v2  ;;  %2588 = vmatprep.subr.msk.mxu1 %vm439_vm0, %v418_v2  ;;  %v1071_v57 = vld [vmem:[%s3154_s17 + $0x40] sm:$0xff]  ;;  %v863_v58 = vld [vmem:[%s3148_s9 + $0x48] sm:$0xff]  ;;  %v864_v60 = vld [vmem:[%s3148_s9 + $0x50] sm:$0xff] }
  0x3f   : > { %v1072_v59 = vld [vmem:[%s3154_s17 + $0x48] sm:$0xff]  ;;  %v1073_v61 = vld [vmem:[%s3154_s17 + $0x50] sm:$0xff]  ;;  %v865_v62 = vld [vmem:[%s3148_s9 + $0x58] sm:$0xff] }
  0x40   : > { %2501 = vmatmul.mubr.msk.f32.vlgmr.msra.gmra.mxu0 %vm439_vm0, %v424_v6  ;;  %2533 = vmatmul.mubr.msk.f32.vlgmr.msra.gmra.mxu1 %vm439_vm0, %v646_v7  ;;  %v1074_v63 = vld [vmem:[%s3154_s17 + $0x58] sm:$0xff]  ;;  %v866_v0 = vld [vmem:[%s3148_s9 + $0x60] sm:$0xff] }
  0x41   : > { %2503 = vmatprep.mubr.msk.f32.mxu0 %vm439_vm0, %v425_v8  ;;  %2535 = vmatprep.mubr.msk.f32.mxu1 %vm439_vm0, %v647_v9  ;;  %v1075_v1 = vld [vmem:[%s3154_s17 + $0x60] sm:$0xff]  ;;  %v869_v6 = vld [vmem:[%s3148_s9 + $0x78] sm:$0xff] }
  0x42   : > { %2557 = vmatpush3.xpose.msk.msra.mxu0 %vm439_vm0, %v418_v2  ;;  %2589 = vmatpush3.xpose.msk.msra.mxu1 %vm439_vm0, %v418_v2  ;;  %v867_v2 = vld [vmem:[%s3148_s9 + $0x68] sm:$0xff]  ;;  %v1078_v7 = vld [vmem:[%s3154_s17 + $0x78] sm:$0xff] }
  0x43   : > { %2558 = vmatprep.subr.msk.mxu0 %vm439_vm0, %v417_v3  ;;  %2590 = vmatprep.subr.msk.mxu1 %vm439_vm0, %v417_v3 }
  0x44   : > { %2504 = vmatmul.mubr.msk.f32.gmra.mxu0 %vm439_vm0, %v426_v10  ;;  %2536 = vmatmul.mubr.msk.f32.gmra.mxu1 %vm439_vm0, %v648_v11 }
  0x45   : > { %2506 = vmatprep.mubr.msk.f32.mxu0 %vm439_vm0, %v427_v12  ;;  %2538 = vmatprep.mubr.msk.f32.mxu1 %vm439_vm0, %v649_v13 }
  0x46   : > { %2559 = vmatpush3.xpose.msk.msra.mxu0 %vm439_vm0, %v417_v3  ;;  %2591 = vmatpush3.xpose.msk.msra.mxu1 %vm439_vm0, %v417_v3  ;;  %v1076_v3 = vld [vmem:[%s3154_s17 + $0x68] sm:$0xff] }
  0x47   : > { %2560 = vmatprep.subr.msk.mxu0 %vm439_vm0, %v416_v4  ;;  %2592 = vmatprep.subr.msk.mxu1 %vm439_vm0, %v416_v4 }
  0x48   : > { %2507 = vmatmul.mubr.msk.f32.gmra.mxu0 %vm439_vm0, %v428_v14  ;;  %2539 = vmatmul.mubr.msk.f32.gmra.mxu1 %vm439_vm0, %v650_v15 }
  0x49   : > { %2509 = vmatprep.mubr.msk.f32.mxu0 %vm439_vm0, %v429_v16  ;;  %2541 = vmatprep.mubr.msk.f32.mxu1 %vm439_vm0, %v651_v17 }
  0x4a   : > { %2561 = vmatpush3.xpose.msk.msra.mxu0 %vm439_vm0, %v416_v4  ;;  %2593 = vmatpush3.xpose.msk.msra.mxu1 %vm439_vm0, %v416_v4  ;;  %v868_v4 = vld [vmem:[%s3148_s9 + $0x70] sm:$0xff]  ;;  %s3490_s9 = scalar_lea.hbm %s3563_s8, %s3016_s22 }
  0x4b   : > { %2562 = vmatprep.subr.msk.mxu0 %vm439_vm0, %v3052_v5  ;;  %2594 = vmatprep.subr.msk.mxu1 %vm439_vm0, %v3052_v5 }
  0x4c   : > { %2510 = vmatmul.mubr.msk.f32.gmra.mxu0 %vm439_vm0, %v430_v18  ;;  %2542 = vmatmul.mubr.msk.f32.gmra.mxu1 %vm439_vm0, %v652_v19 }
  0x4d   : > { %2512 = vmatprep.mubr.msk.f32.mxu0 %vm439_vm0, %v431_v20  ;;  %2544 = vmatprep.mubr.msk.f32.mxu1 %vm439_vm0, %v653_v21 }
  0x4e   : > { %2563 = vmatpush3.xpose.msk.msra.mxu0 %vm439_vm0, %v3052_v5  ;;  %2595 = vmatpush3.xpose.msk.msra.mxu1 %vm439_vm0, %v3052_v5  ;;  %v1077_v5 = vld [vmem:[%s3154_s17 + $0x70] sm:$0xff]  ;;  %s2916_s17 = smov [#allocation4]  }
  0x4f   : > { %2620 = vmatprep.subr.msk.mxu0 %vm439_vm0, %v422_v22  ;;  %2652 = vmatprep.subr.msk.mxu1 %vm439_vm0, %v422_v22  ;;  %s2822_s23 = sshll.u32 %s2916_s17, 4  ;;  %s2823_s23 = int_to_ptr.vmem [resolvable:$false] %s2822_s23 }
  0x50   : > { %2513 = vmatmul.mubr.msk.f32.gmra.mxu0 %vm439_vm0, %v432_v23  ;;  %2545 = vmatmul.mubr.msk.f32.gmra.mxu1 %vm439_vm0, %v654_v24  ;;  %s2824_s25 = scalar_lea.vmem %s2823_s23, 32  ;;  %p2825_p7 = scmp.lt.s32.totalorder %s3484_s30, %s2823_s23 }
  0x51   : > { %2515 = vmatprep.mubr.msk.f32.mxu0 %vm439_vm0, %v433_v25  ;;  %2547 = vmatprep.mubr.msk.f32.mxu1 %vm439_vm0, %v655_v26  ;;  %p2826_p8 = scmp.lt.s32.totalorder %s2824_s25, %s2818_s16 }
  0x53   : > { %p2827_p9 = por %p2826_p8, %p2825_p7 }
  0x54   : > { %2516 = vmatmul.mubr.msk.f32.gmra.mxu0 %vm439_vm0, %v434_v27  ;;  %2548 = vmatmul.mubr.msk.f32.gmra.mxu1 %vm439_vm0, %v656_v28 }
  0x55   : > { %2518 = vmatprep.mubr.msk.f32.mxu0 %vm439_vm0, %v435_v29  ;;  %2550 = vmatprep.mubr.msk.f32.mxu1 %vm439_vm0, %v657_v30  ;;  %p2828_p12 = pnand %p2827_p9, %p2821_p6 }
  0x58   : > { %2519 = vmatmul.mubr.msk.f32.gmra.mxu0 %vm439_vm0, %v436_v31  ;;  %2551 = vmatmul.mubr.msk.f32.gmra.mxu1 %vm439_vm0, %v658_v32 }
  0x59   : > { %2521 = vmatprep.mubr.msk.f32.mxu0 %vm439_vm0, %v437_v33  ;;  %2553 = vmatprep.mubr.msk.f32.mxu1 %vm439_vm0, %v659_v34 }
  0x5c   : > { %2522 = vmatmul.mubr.msk.f32.gmra.mxu0 %vm439_vm0, %v438_v35  ;;  %2554 = vmatmul.mubr.msk.f32.gmra.mxu1 %vm439_vm0, %v660_v36 }
  0x5d   : > { %2564 = vmatprep.mubr.msk.f32.mxu0 %vm439_vm0, %v854_v37  ;;  %2596 = vmatprep.mubr.msk.f32.mxu1 %vm439_vm0, %v1063_v38 }
  0x60   : > { %2565 = vmatmul.mubr.msk.f32.vlgmr.msra.gmra.mxu0 %vm439_vm0, %v855_v39  ;;  %2597 = vmatmul.mubr.msk.f32.vlgmr.msra.gmra.mxu1 %vm439_vm0, %v1064_v40  ;;  %v3564_v40 = vmov 0.0  }
  0x61   : > { %2621 = vmatpush3.xpose.msk.msra.mxu0 %vm439_vm0, %v422_v22  ;;  %2653 = vmatpush3.xpose.msk.msra.mxu1 %vm439_vm0, %v422_v22 }
  0x62   : > { %2567 = vmatprep.mubr.msk.f32.mxu0 %vm439_vm0, %v856_v41  ;;  %2599 = vmatprep.mubr.msk.f32.mxu1 %vm439_vm0, %v1065_v42 }
  0x63   : > { %2622 = vmatprep.subr.msk.mxu0 %vm439_vm0, %v421_v43  ;;  %2654 = vmatprep.subr.msk.mxu1 %vm439_vm0, %v421_v43 }
  0x64   : > { %2568 = vmatmul.mubr.msk.f32.gmra.mxu0 %vm439_vm0, %v857_v44  ;;  %2600 = vmatmul.mubr.msk.f32.gmra.mxu1 %vm439_vm0, %v1066_v45 }
  0x65   : > { %2570 = vmatprep.mubr.msk.f32.mxu0 %vm439_vm0, %v858_v46  ;;  %2602 = vmatprep.mubr.msk.f32.mxu1 %vm439_vm0, %v1067_v47 }
  0x66   : > { %2623 = vmatpush3.xpose.msk.msra.mxu0 %vm439_vm0, %v421_v43  ;;  %2655 = vmatpush3.xpose.msk.msra.mxu1 %vm439_vm0, %v421_v43 }
  0x67   : > { %2624 = vmatprep.subr.msk.mxu0 %vm439_vm0, %v420_v48  ;;  %2656 = vmatprep.subr.msk.mxu1 %vm439_vm0, %v420_v48 }
  0x68   : > { %2571 = vmatmul.mubr.msk.f32.gmra.mxu0 %vm439_vm0, %v859_v49  ;;  %2603 = vmatmul.mubr.msk.f32.gmra.mxu1 %vm439_vm0, %v1068_v50 }
  0x69   : > { %2573 = vmatprep.mubr.msk.f32.mxu0 %vm439_vm0, %v860_v51  ;;  %2605 = vmatprep.mubr.msk.f32.mxu1 %vm439_vm0, %v1069_v52 }
  0x6a   : > { %2625 = vmatpush3.xpose.msk.msra.mxu0 %vm439_vm0, %v420_v48  ;;  %2657 = vmatpush3.xpose.msk.msra.mxu1 %vm439_vm0, %v420_v48 }
  0x6b   : > { %2626 = vmatprep.subr.msk.mxu0 %vm439_vm0, %v419_v53  ;;  %2658 = vmatprep.subr.msk.mxu1 %vm439_vm0, %v419_v53 }
  0x6c   : > { %2574 = vmatmul.mubr.msk.f32.gmra.mxu0 %vm439_vm0, %v861_v54  ;;  %2606 = vmatmul.mubr.msk.f32.gmra.mxu1 %vm439_vm0, %v1070_v55 }
  0x6d   : > { %2576 = vmatprep.mubr.msk.f32.mxu0 %vm439_vm0, %v862_v56  ;;  %2608 = vmatprep.mubr.msk.f32.mxu1 %vm439_vm0, %v1071_v57 }
  0x6e   : > { %2627 = vmatpush3.xpose.msk.msra.mxu0 %vm439_vm0, %v419_v53  ;;  %2659 = vmatpush3.xpose.msk.msra.mxu1 %vm439_vm0, %v419_v53 }
  0x6f   : > { %2684 = vmatprep.subr.mxu0 %v3564_v40  ;;  %2719 = vmatprep.subr.mxu1 %v3564_v40 }
  0x70   : > { %2577 = vmatmul.mubr.msk.f32.gmra.mxu0 %vm439_vm0, %v863_v58  ;;  %2609 = vmatmul.mubr.msk.f32.gmra.mxu1 %vm439_vm0, %v1072_v59 }
  0x71   : > { %2579 = vmatprep.mubr.msk.f32.mxu0 %vm439_vm0, %v864_v60  ;;  %2611 = vmatprep.mubr.msk.f32.mxu1 %vm439_vm0, %v1073_v61 }
  0x74   : > { %2580 = vmatmul.mubr.msk.f32.gmra.mxu0 %vm439_vm0, %v865_v62  ;;  %2612 = vmatmul.mubr.msk.f32.gmra.mxu1 %vm439_vm0, %v1074_v63 }
  0x75   : > { %2582 = vmatprep.mubr.msk.f32.mxu0 %vm439_vm0, %v866_v0  ;;  %2614 = vmatprep.mubr.msk.f32.mxu1 %vm439_vm0, %v1075_v1 }
  0x78   : > { %2583 = vmatmul.mubr.msk.f32.gmra.mxu0 %vm439_vm0, %v867_v2  ;;  %2615 = vmatmul.mubr.msk.f32.gmra.mxu1 %vm439_vm0, %v1076_v3 }
  0x79   : > { %2585 = vmatprep.mubr.msk.f32.mxu0 %vm439_vm0, %v868_v4  ;;  %2617 = vmatprep.mubr.msk.f32.mxu1 %vm439_vm0, %v1077_v5 }
  0x7c   : > { %2586 = vmatmul.mubr.msk.f32.gmra.mxu0 %vm439_vm0, %v869_v6  ;;  %2618 = vmatmul.mubr.msk.f32.gmra.mxu1 %vm439_vm0, %v1078_v7 }
 0x100   : > { %v2502_v8 = vpop.f32.mrf.mxu0  ;;  %v2534_v9 = vpop.f32.mrf.mxu1 }
 0x102   : > { %v566_v10 = vpop.f32.mrf.mxu0  ;;  %v775_v11 = vpop.f32.mrf.mxu1 }
 0x103   : > { %2628 = vmatprep.mubr.msk.f32.mxu0 %vm439_vm0, %v566_v10  ;;  %2660 = vmatprep.mubr.msk.f32.mxu1 %vm439_vm0, %v775_v11 }
 0x104   : > { %v2505_v12 = vpop.f32.mrf.mxu0  ;;  %v2537_v13 = vpop.f32.mrf.mxu1  ;;  %2629 = vmatmul.mubr.msk.f32.vlgmr.msra.gmra.mxu0 %vm439_vm0, %v2502_v8  ;;  %2661 = vmatmul.mubr.msk.f32.vlgmr.msra.gmra.mxu1 %vm439_vm0, %v2534_v9 }
 0x106   : > { %v576_v14 = vpop.f32.mrf.mxu0  ;;  %v785_v15 = vpop.f32.mrf.mxu1 }
 0x107   : > { %2631 = vmatprep.mubr.msk.f32.mxu0 %vm439_vm0, %v576_v14  ;;  %2663 = vmatprep.mubr.msk.f32.mxu1 %vm439_vm0, %v785_v15 }
 0x108   : > { %v2508_v16 = vpop.f32.mrf.mxu0  ;;  %v2540_v17 = vpop.f32.mrf.mxu1  ;;  %2632 = vmatmul.mubr.msk.f32.gmra.mxu0 %vm439_vm0, %v2505_v12  ;;  %2664 = vmatmul.mubr.msk.f32.gmra.mxu1 %vm439_vm0, %v2537_v13 }
 0x10a   : > { %v586_v18 = vpop.f32.mrf.mxu0  ;;  %v795_v19 = vpop.f32.mrf.mxu1 }
 0x10b   : > { %2634 = vmatprep.mubr.msk.f32.mxu0 %vm439_vm0, %v586_v18  ;;  %2666 = vmatprep.mubr.msk.f32.mxu1 %vm439_vm0, %v795_v19 }
 0x10c   : > { %v2511_v20 = vpop.f32.mrf.mxu0  ;;  %v2543_v21 = vpop.f32.mrf.mxu1  ;;  %2635 = vmatmul.mubr.msk.f32.gmra.mxu0 %vm439_vm0, %v2508_v16  ;;  %2667 = vmatmul.mubr.msk.f32.gmra.mxu1 %vm439_vm0, %v2540_v17 }
 0x10e   : > { %v596_v22 = vpop.f32.mrf.mxu0  ;;  %v805_v23 = vpop.f32.mrf.mxu1 }
 0x10f   : > { %2637 = vmatprep.mubr.msk.f32.mxu0 %vm439_vm0, %v596_v22  ;;  %2669 = vmatprep.mubr.msk.f32.mxu1 %vm439_vm0, %v805_v23 }
 0x110   : > { %v2514_v24 = vpop.f32.mrf.mxu0  ;;  %v2546_v25 = vpop.f32.mrf.mxu1  ;;  %2638 = vmatmul.mubr.msk.f32.gmra.mxu0 %vm439_vm0, %v2511_v20  ;;  %2670 = vmatmul.mubr.msk.f32.gmra.mxu1 %vm439_vm0, %v2543_v21 }
 0x112   : > { %v606_v26 = vpop.f32.mrf.mxu0  ;;  %v815_v27 = vpop.f32.mrf.mxu1 }
 0x113   : > { %2640 = vmatprep.mubr.msk.f32.mxu0 %vm439_vm0, %v606_v26  ;;  %2672 = vmatprep.mubr.msk.f32.mxu1 %vm439_vm0, %v815_v27 }
 0x114   : > { %v2517_v28 = vpop.f32.mrf.mxu0  ;;  %v2549_v29 = vpop.f32.mrf.mxu1  ;;  %2641 = vmatmul.mubr.msk.f32.gmra.mxu0 %vm439_vm0, %v2514_v24  ;;  %2673 = vmatmul.mubr.msk.f32.gmra.mxu1 %vm439_vm0, %v2546_v25 }
 0x116   : > { %v616_v30 = vpop.f32.mrf.mxu0  ;;  %v825_v31 = vpop.f32.mrf.mxu1 }
 0x117   : > { %2643 = vmatprep.mubr.msk.f32.mxu0 %vm439_vm0, %v616_v30  ;;  %2675 = vmatprep.mubr.msk.f32.mxu1 %vm439_vm0, %v825_v31 }
 0x118   : > { %v2520_v32 = vpop.f32.mrf.mxu0  ;;  %v2552_v33 = vpop.f32.mrf.mxu1  ;;  %2644 = vmatmul.mubr.msk.f32.gmra.mxu0 %vm439_vm0, %v2517_v28  ;;  %2676 = vmatmul.mubr.msk.f32.gmra.mxu1 %vm439_vm0, %v2549_v29 }
 0x11a   : > { %v626_v34 = vpop.f32.mrf.mxu0  ;;  %v835_v35 = vpop.f32.mrf.mxu1 }
 0x11b   : > { %2646 = vmatprep.mubr.msk.f32.mxu0 %vm439_vm0, %v626_v34  ;;  %2678 = vmatprep.mubr.msk.f32.mxu1 %vm439_vm0, %v835_v35 }
 0x11c   : > { %v2523_v36 = vpop.f32.mrf.mxu0  ;;  %v2555_v37 = vpop.f32.mrf.mxu1  ;;  %2647 = vmatmul.mubr.msk.f32.gmra.mxu0 %vm439_vm0, %v2520_v32  ;;  %2679 = vmatmul.mubr.msk.f32.gmra.mxu1 %vm439_vm0, %v2552_v33 }
 0x11e   : > { %v636_v38 = vpop.f32.mrf.mxu0  ;;  %v845_v39 = vpop.f32.mrf.mxu1 }
 0x11f   : > { %2649 = vmatprep.mubr.msk.f32.mxu0 %vm439_vm0, %v636_v38  ;;  %2681 = vmatprep.mubr.msk.f32.mxu1 %vm439_vm0, %v845_v39 }
 0x120   : > { %2650 = vmatmul.mubr.msk.f32.gmra.mxu0 %vm439_vm0, %v2523_v36  ;;  %2682 = vmatmul.mubr.msk.f32.gmra.mxu1 %vm439_vm0, %v2555_v37  ;;  %v3279_v41 = vpop.f32.mrf.mxu0  ;;  %v3281_v42 = vpop.f32.mrf.mxu1 }
 0x121   : > { %3569 = vst [vmem:[#allocation11_spill] sm:$0xff] %v3279_v41  ;;  %3570 = vst [vmem:[#allocation12_spill] sm:$0xff] %v3281_v42  ;;  %2716 = vmatprep.mubr.msk.f32.mxu0 %vm2914_vm1, %v3564_v40  ;;  %2751 = vmatprep.mubr.msk.f32.mxu1 %vm2914_vm1, %v3564_v40 }
 0x122   : > { %v3283_v43 = vpop.f32.mrf.mxu0  ;;  %v3285_v44 = vpop.f32.mrf.mxu1 }
 0x123   : > { %3571 = vst [vmem:[#allocation13_spill] sm:$0xff] %v3283_v43  ;;  %3572 = vst [vmem:[#allocation14_spill] sm:$0xff] %v3285_v44 }
 0x124   : > { %v3287_v45 = vpop.f32.mrf.mxu0  ;;  %v3289_v46 = vpop.f32.mrf.mxu1 }
 0x126   : > { %v3291_v47 = vpop.f32.mrf.mxu0  ;;  %v3293_v48 = vpop.f32.mrf.mxu1 }
 0x127   : > { %3573 = vst [vmem:[#allocation15_spill] sm:$0xff] %v3293_v48 }
 0x128   : > { %v3295_v49 = vpop.f32.mrf.mxu0  ;;  %v3297_v50 = vpop.f32.mrf.mxu1 }
 0x12a   : > { %v3299_v51 = vpop.f32.mrf.mxu0  ;;  %v3301_v52 = vpop.f32.mrf.mxu1 }
 0x12c   : > { %v3303_v53 = vpop.f32.mrf.mxu0  ;;  %v3305_v54 = vpop.f32.mrf.mxu1 }
 0x12e   : > { %v3307_v55 = vpop.f32.mrf.mxu0  ;;  %v3309_v56 = vpop.f32.mrf.mxu1 }
 0x130   : > { %v3313_v57 = vpop.f32.mrf.mxu0  ;;  %v3315_v58 = vpop.f32.mrf.mxu1 }
 0x132   : > { %v3317_v59 = vpop.f32.mrf.mxu0  ;;  %v3319_v60 = vpop.f32.mrf.mxu1 }
 0x134   : > { %v3321_v61 = vpop.f32.mrf.mxu0  ;;  %v3323_v62 = vpop.f32.mrf.mxu1 }
 0x136   : > { %v3325_v63 = vpop.f32.mrf.mxu0  ;;  %v3327_v0 = vpop.f32.mrf.mxu1 }
 0x138   : > { %v2584_v1 = vpop.f32.mrf.mxu0  ;;  %v2616_v2 = vpop.f32.mrf.mxu1 }
 0x13a   : > { %v1044_v3 = vpop.f32.mrf.mxu0  ;;  %v1253_v4 = vpop.f32.mrf.mxu1 }
 0x13c   : > { %v2587_v5 = vpop.f32.mrf.mxu0  ;;  %v2619_v6 = vpop.f32.mrf.mxu1 }
 0x13e   : > { %v1054_v7 = vpop.f32.mrf.mxu0  ;;  %v1263_v8 = vpop.f32.mrf.mxu1 }
 0x1c4   : > { %v3329_v9 = vpop.f32.mrf.mxu0  ;;  %v3331_v10 = vpop.f32.mrf.mxu1 }
 0x1c5   : > { %3574 = vst [vmem:[#allocation16_spill] sm:$0xff] %v3329_v9  ;;  %3575 = vst [vmem:[#allocation17_spill] sm:$0xff] %v3331_v10  ;;  %v3580_v9 = vmov 0.0  }
 0x1c6   : > { %v3333_v11 = vpop.f32.mrf.mxu0  ;;  %v3335_v12 = vpop.f32.mrf.mxu1 }
 0x1c7   : > { %3576 = vst [vmem:[#allocation18_spill] sm:$0xff] %v3333_v11  ;;  %3577 = vst [vmem:[#allocation19_spill] sm:$0xff] %v3335_v12 }
 0x1c8   : > { %v3337_v13 = vpop.f32.mrf.mxu0  ;;  %v3339_v14 = vpop.f32.mrf.mxu1 }
 0x1ca   : > { %v3341_v15 = vpop.f32.mrf.mxu0  ;;  %v3343_v16 = vpop.f32.mrf.mxu1 }
 0x1cb   : > { %3578 = vst [vmem:[#allocation20_spill] sm:$0xff] %v3341_v15  ;;  %3579 = vst [vmem:[#allocation21_spill] sm:$0xff] %v3343_v16 }
 0x1cc   : > { %v3345_v17 = vpop.f32.mrf.mxu0  ;;  %v3347_v18 = vpop.f32.mrf.mxu1 }
 0x1ce   : > { %v3349_v19 = vpop.f32.mrf.mxu0  ;;  %v3351_v20 = vpop.f32.mrf.mxu1 }
 0x1d0   : > { %v3353_v21 = vpop.f32.mrf.mxu0  ;;  %v3355_v22 = vpop.f32.mrf.mxu1 }
 0x1d2   : > { %v3357_v23 = vpop.f32.mrf.mxu0  ;;  %v3359_v24 = vpop.f32.mrf.mxu1 }
 0x1d4   : > { %v2642_v25 = vpop.f32.mrf.mxu0  ;;  %v2674_v26 = vpop.f32.mrf.mxu1 }
 0x1d6   : > { %v3361_v27 = vpop.f32.mrf.mxu0  ;;  %v3363_v28 = vpop.f32.mrf.mxu1 }
 0x1d8   : > { %v2645_v29 = vpop.f32.mrf.mxu0  ;;  %v2677_v30 = vpop.f32.mrf.mxu1 }
 0x1da   : > { %v1448_v31 = vpop.f32.mrf.mxu0  ;;  %v1641_v32 = vpop.f32.mrf.mxu1 }
 0x1dc   : > { %v2648_v33 = vpop.f32.mrf.mxu0  ;;  %v2680_v34 = vpop.f32.mrf.mxu1 }
 0x1dd   : > { %v1683_v41 = vsub.f32 %v2648_v33, %v2584_v1  ;;  %v1699_v16 = vsub.f32 %v2680_v34, %v2616_v2  ;;  %v3588_v34 = vld [vmem:[#allocation13_spill] sm:$0xff] }
 0x1de   : > { %v1458_v35 = vpop.f32.mrf.mxu0  ;;  %v1651_v36 = vpop.f32.mrf.mxu1 }
 0x1e0   : > { %v2651_v37 = vpop.f32.mrf.mxu0  ;;  %v2683_v38 = vpop.f32.mrf.mxu1 }
 0x1e1   : > { %v1685_v39 = vsub.f32 %v2651_v37, %v2587_v5  ;;  %v1701_v40 = vsub.f32 %v2683_v38, %v2619_v6  ;;  %v1682_v5 = vsub.f32 %v1458_v35, %v1044_v3  ;;  %v1696_v6 = vsub.f32 %v1641_v32, %v3327_v0  ;;  %v3589_v35 = vld [vmem:[#allocation18_spill] sm:$0xff]  ;;  %v3591_v38 = vld [vmem:[#allocation19_spill] sm:$0xff] }
 0x1e2   : > { %v1468_v12 = vpop.f32.mrf.mxu0  ;;  %v1661_v44 = vpop.f32.mrf.mxu1  ;;  %v3590_v37 = vld [vmem:[#allocation14_spill] sm:$0xff] }
 0x1e3   : > { %v1717_v11 = vmul.f32 %v1685_v39, %v1685_v39  ;;  %v1854_v43 = vmul.f32 %v1701_v40, %v1701_v40  ;;  %v1684_v10 = vsub.f32 %v1468_v12, %v1054_v7  ;;  %v1700_v42 = vsub.f32 %v1661_v44, %v1263_v8 }
 0x1e4   : > { %v1715_v40 = vmul.f32 %v1683_v41, %v1683_v41  ;;  %v1852_v44 = vmul.f32 %v1699_v16, %v1699_v16  ;;  %v1714_v1 = vmul.f32 %v1682_v5, %v1682_v5  ;;  %v1849_v8 = vmul.f32 %v1696_v6, %v1696_v6 }
 0x1e5   : > { %2685 = vmatpush3.xpose.msk.msra.mxu0 %vm439_vm0, %v1717_v11  ;;  %2720 = vmatpush3.xpose.msk.msra.mxu1 %vm439_vm0, %v1854_v43  ;;  %v1716_v48 = vmul.f32 %v1684_v10, %v1684_v10  ;;  %v1853_v15 = vmul.f32 %v1700_v42, %v1700_v42  ;;  %v1698_v43 = vsub.f32 %v1651_v36, %v1253_v4  ;;  %v2915_v5 = vmov 1.0  }
 0x1e6   : > { %2686 = vmatprep.subr.mxu0 %v3580_v9  ;;  %2721 = vmatprep.subr.mxu1 %v3580_v9  ;;  %v1681_v42 = vsub.f32 %v2645_v29, %v3321_v61  ;;  %v1680_v4 = vsub.f32 %v1448_v31, %v3325_v63  ;;  %v1679_v61 = vsub.f32 %v2642_v25, %v3313_v57  ;;  %v3587_v29 = vld [vmem:[#allocation17_spill] sm:$0xff] }
 0x1e7   : > { %v1851_v2 = vmul.f32 %v1698_v43, %v1698_v43  ;;  %v1678_v10 = vsub.f32 %v3361_v27, %v3317_v59  ;;  %v1694_v57 = vsub.f32 %v3363_v28, %v3319_v60  ;;  %v1693_v11 = vsub.f32 %v3355_v22, %v3305_v54  ;;  %v3586_v28 = vld [vmem:[#allocation12_spill] sm:$0xff] }
 0x1e8   : > { %v1713_v41 = vmul.f32 %v1681_v42, %v1681_v42  ;;  %v1712_v7 = vmul.f32 %v1680_v4, %v1680_v4  ;;  %v1711_v63 = vmul.f32 %v1679_v61, %v1679_v61  ;;  %v1676_v16 = vsub.f32 %v3357_v23, %v3307_v55 }
 0x1e9   : > { %2687 = vmatpush3.xpose.msk.msra.mxu0 %vm439_vm0, %v1716_v48  ;;  %2722 = vmatpush3.xpose.msk.msra.mxu1 %vm439_vm0, %v1853_v15  ;;  %v1697_v48 = vsub.f32 %v2677_v30, %v3323_v62  ;;  %v1695_v62 = vsub.f32 %v2674_v26, %v3315_v58  ;;  %v1677_v58 = vsub.f32 %v3353_v21, %v3303_v53  ;;  %v3582_v26 = vld [vmem:[#allocation15_spill] sm:$0xff] }
 0x1ea   : > { %2688 = vmatprep.subr.mxu0 %v3580_v9  ;;  %2723 = vmatprep.subr.mxu1 %v3580_v9  ;;  %v1710_v12 = vmul.f32 %v1678_v10, %v1678_v10  ;;  %v1847_v15 = vmul.f32 %v1694_v57, %v1694_v57  ;;  %v1846_v60 = vmul.f32 %v1693_v11, %v1693_v11 }
 0x1eb   : > { %v1850_v3 = vmul.f32 %v1697_v48, %v1697_v48  ;;  %v1848_v0 = vmul.f32 %v1695_v62, %v1695_v62  ;;  %v1709_v59 = vmul.f32 %v1677_v58, %v1677_v58  ;;  %v1692_v53 = vsub.f32 %v3359_v24, %v3309_v56 }
 0x1ec   : > { %v1675_v54 = vsub.f32 %v3345_v17, %v3295_v49  ;;  %v1691_v21 = vsub.f32 %v3347_v18, %v3297_v50  ;;  %v1708_v22 = vmul.f32 %v1676_v16, %v1676_v16  ;;  %v1674_v23 = vsub.f32 %v3349_v19, %v3299_v51  ;;  %v3581_v19 = vld [vmem:[#allocation20_spill] sm:$0xff] }
 0x1ed   : > { %2689 = vmatpush3.xpose.msk.msra.mxu0 %vm439_vm0, %v1715_v40  ;;  %2724 = vmatpush3.xpose.msk.msra.mxu1 %vm439_vm0, %v1852_v44  ;;  %v1845_v25 = vmul.f32 %v1692_v53, %v1692_v53  ;;  %v1690_v49 = vsub.f32 %v3351_v20, %v3301_v52  ;;  %v1673_v50 = vsub.f32 %v3337_v13, %v3287_v45  ;;  %v3583_v45 = vld [vmem:[#allocation21_spill] sm:$0xff] }
 0x1ee   : > { %2690 = vmatprep.subr.mxu0 %v3580_v9  ;;  %2725 = vmatprep.subr.mxu1 %v3580_v9  ;;  %v1707_v55 = vmul.f32 %v1675_v54, %v1675_v54  ;;  %v1844_v56 = vmul.f32 %v1691_v21, %v1691_v21  ;;  %v1689_v17 = vsub.f32 %v3339_v14, %v3289_v46  ;;  %v3584_v46 = vld [vmem:[#allocation11_spill] sm:$0xff]  ;;  %v3585_v14 = vld [vmem:[#allocation16_spill] sm:$0xff] }
 0x1ef   : > { %v1706_v18 = vmul.f32 %v1674_v23, %v1674_v23  ;;  %v1843_v24 = vmul.f32 %v1690_v49, %v1690_v49  ;;  %v1705_v51 = vmul.f32 %v1673_v50, %v1673_v50  ;;  %v1672_v20 = vsub.f32 %v3581_v19, %v3291_v47 }
 0x1f0   : > { %v1842_v52 = vmul.f32 %v1689_v17, %v1689_v17  ;;  %v1688_v13 = vsub.f32 %v3583_v45, %v3582_v26  ;;  %v1671_v27 = vsub.f32 %v3585_v14, %v3584_v46  ;;  %v1687_v30 = vsub.f32 %v3587_v29, %v3586_v28 }
 0x1f1   : > { %2691 = vmatpush3.xpose.msk.msra.mxu0 %vm439_vm0, %v1714_v1  ;;  %2726 = vmatpush3.xpose.msk.msra.mxu1 %vm439_vm0, %v1851_v2  ;;  %v1704_v31 = vmul.f32 %v1672_v20, %v1672_v20  ;;  %v1670_v36 = vsub.f32 %v3589_v35, %v3588_v34  ;;  %v1686_v39 = vsub.f32 %v3591_v38, %v3590_v37 }
 0x1f2   : > { %2692 = vmatprep.subr.mxu0 %v3580_v9  ;;  %2727 = vmatprep.subr.mxu1 %v3580_v9  ;;  %v1841_v32 = vmul.f32 %v1688_v13, %v1688_v13  ;;  %v1703_v47 = vmul.f32 %v1671_v27, %v1671_v27  ;;  %v1840_v33 = vmul.f32 %v1687_v30, %v1687_v30 }
 0x1f3   : > { %v1702_v40 = vmul.f32 %v1670_v36, %v1670_v36  ;;  %v1839_v44 = vmul.f32 %v1686_v39, %v1686_v39 }
 0x1f5   : > { %2693 = vmatpush3.xpose.msk.msra.mxu0 %vm439_vm0, %v1713_v41  ;;  %2728 = vmatpush3.xpose.msk.msra.mxu1 %vm439_vm0, %v1850_v3 }
 0x1f6   : > { %2694 = vmatprep.subr.mxu0 %v3580_v9  ;;  %2729 = vmatprep.subr.mxu1 %v3580_v9 }
 0x1f9   : > { %2695 = vmatpush3.xpose.msk.msra.mxu0 %vm439_vm0, %v1712_v7  ;;  %2730 = vmatpush3.xpose.msk.msra.mxu1 %vm439_vm0, %v1849_v8 }
 0x1fa   : > { %2696 = vmatprep.subr.mxu0 %v3580_v9  ;;  %2731 = vmatprep.subr.mxu1 %v3580_v9 }
 0x1fd   : > { %2697 = vmatpush3.xpose.msk.msra.mxu0 %vm439_vm0, %v1711_v63  ;;  %2732 = vmatpush3.xpose.msk.msra.mxu1 %vm439_vm0, %v1848_v0 }
 0x1fe   : > { %2698 = vmatprep.subr.mxu0 %v3580_v9  ;;  %2733 = vmatprep.subr.mxu1 %v3580_v9 }
 0x201   : > { %2699 = vmatpush3.xpose.msk.msra.mxu0 %vm439_vm0, %v1710_v12  ;;  %2734 = vmatpush3.xpose.msk.msra.mxu1 %vm439_vm0, %v1847_v15 }
 0x202   : > { %2700 = vmatprep.subr.mxu0 %v3580_v9  ;;  %2735 = vmatprep.subr.mxu1 %v3580_v9 }
 0x205   : > { %2701 = vmatpush3.xpose.msk.msra.mxu0 %vm439_vm0, %v1709_v59  ;;  %2736 = vmatpush3.xpose.msk.msra.mxu1 %vm439_vm0, %v1846_v60 }
 0x206   : > { %2702 = vmatprep.subr.mxu0 %v3580_v9  ;;  %2737 = vmatprep.subr.mxu1 %v3580_v9 }
 0x209   : > { %2703 = vmatpush3.xpose.msk.msra.mxu0 %vm439_vm0, %v1708_v22  ;;  %2738 = vmatpush3.xpose.msk.msra.mxu1 %vm439_vm0, %v1845_v25 }
 0x20a   : > { %2704 = vmatprep.subr.mxu0 %v3580_v9  ;;  %2739 = vmatprep.subr.mxu1 %v3580_v9 }
 0x20d   : > { %2705 = vmatpush3.xpose.msk.msra.mxu0 %vm439_vm0, %v1707_v55  ;;  %2740 = vmatpush3.xpose.msk.msra.mxu1 %vm439_vm0, %v1844_v56 }
 0x20e   : > { %2706 = vmatprep.subr.mxu0 %v3580_v9  ;;  %2741 = vmatprep.subr.mxu1 %v3580_v9 }
 0x211   : > { %2707 = vmatpush3.xpose.msk.msra.mxu0 %vm439_vm0, %v1706_v18  ;;  %2742 = vmatpush3.xpose.msk.msra.mxu1 %vm439_vm0, %v1843_v24 }
 0x212   : > { %2708 = vmatprep.subr.mxu0 %v3580_v9  ;;  %2743 = vmatprep.subr.mxu1 %v3580_v9 }
 0x215   : > { %2709 = vmatpush3.xpose.msk.msra.mxu0 %vm439_vm0, %v1705_v51  ;;  %2744 = vmatpush3.xpose.msk.msra.mxu1 %vm439_vm0, %v1842_v52 }
 0x216   : > { %2710 = vmatprep.subr.mxu0 %v3580_v9  ;;  %2745 = vmatprep.subr.mxu1 %v3580_v9 }
 0x219   : > { %2711 = vmatpush3.xpose.msk.msra.mxu0 %vm439_vm0, %v1704_v31  ;;  %2746 = vmatpush3.xpose.msk.msra.mxu1 %vm439_vm0, %v1841_v32 }
 0x21a   : > { %2712 = vmatprep.subr.mxu0 %v3580_v9  ;;  %2747 = vmatprep.subr.mxu1 %v3580_v9 }
 0x21d   : > { %2713 = vmatpush3.xpose.msk.msra.mxu0 %vm439_vm0, %v1703_v47  ;;  %2748 = vmatpush3.xpose.msk.msra.mxu1 %vm439_vm0, %v1840_v33 }
 0x21e   : > { %2714 = vmatprep.subr.mxu0 %v3580_v9  ;;  %2749 = vmatprep.subr.mxu1 %v3580_v9 }
 0x221   : > { %2715 = vmatpush3.xpose.msk.msra.mxu0 %vm439_vm0, %v1702_v40  ;;  %2750 = vmatpush3.xpose.msk.msra.mxu1 %vm439_vm0, %v1839_v44 }
 0x224   : > { %2717 = vmatmul.mubr.msk.f32.vlgmr.msra.gmra.mxu0 %vm439_vm0, %v2915_v5  ;;  %2752 = vmatmul.mubr.msk.f32.vlgmr.msra.gmra.mxu1 %vm439_vm0, %v2915_v5 }
 0x2e4   : > { %v1835_v43 = vpop.f32.mrf.mxu0  ;;  %v1969_v42 = vpop.f32.mrf.mxu1 }
 0x2e5   : > { %2802 = vrsqrt.f32 %v1835_v43  ;;  %vm1975_vm2 = vcmp.eq.f32.partialorder %v1835_v43, inf  ;;  %v1978_v3 = vand.u32 2147483648, %v1835_v43  ;;  %vm1977_vm3 = vcmp.eq.f32.partialorder %v1835_v43, 0.0 }
 0x2e6   : > { %2804 = vrsqrt.f32 %v1969_v42  ;;  %v2718_v48 = vpop.f32.mrf.mxu0  ;;  %v2753_v1 = vpop.f32.mrf.mxu1  ;;  %vm1983_vm4 = vcmp.eq.f32.partialorder %v1969_v42, inf  ;;  %v1986_v61 = vand.u32 2147483648, %v1969_v42  ;;  %vm1985_vm5 = vcmp.eq.f32.partialorder %v1969_v42, 0.0 }
 0x2f2   : > { %v2803_v9 = vpop.eup %2802 }
 0x2f3   : > { %v2805_v2 = vpop.eup %2804  ;;  %v1974_v41 = vmul.f32 %v2803_v9, %v1835_v43 }
 0x2f4   : > { %v1982_v4 = vmul.f32 %v2805_v2, %v1969_v42 }
 0x2f5   : > { %v1976_v6 = vsel %vm1975_vm2, %v1835_v43, %v1974_v41 }
 0x2f6   : > { %v1979_v62 = vsel %vm1977_vm3, %v1978_v3, %v1976_v6  ;;  %v1984_v7 = vsel %vm1983_vm4, %v1969_v42, %v1982_v4 }
 0x2f7   : > { %1980 = vst [vmem:[%s370_s27] sm:$0x1] %v1979_v62  ;;  %v1987_v8 = vsel %vm1985_vm5, %v1986_v61, %v1984_v7 }
 0x2f8   : > { %2831 = shalt.err (!%p2828_p12)
}
 0x2f9   : > { %s2832_s22 = scalar_lea.hbm %s3482_s26, 16  ;;  %s2836_s29 = scalar_lea.hbm %s3562_s7, 112 }
 0x2fa   : > { %p2833_p13 = scmp.ne.s32.totalorder %s3482_s26, %s2832_s22  ;;  %p2837_p2 = scmp.lt.s32.totalorder %s3482_s26, %s3562_s7 }
 0x2fb   : > { %p2838_p3 = scmp.lt.s32.totalorder %s2836_s29, %s2832_s22 }
 0x2fc   : > { %p2834_p0 = pnand %p2833_p13, %p3004_p10 }
 0x2fd   : > { %p2839_p4 = por %p2838_p3, %p2837_p2 }
 0x2fe   : > { %p2835_p1 = pneg %p2834_p0 }
 0x300   : > { %p2840_p5 = pnand %p2839_p4, %p2835_p1 }
 0x302   : > { %2843 = shalt.err (!%p2840_p5)
}
 0x303   : > { %2754 = dma.vmem_to_hbm [thread:$0]  (%p3004_p10), %s3484_s30, 16, %s3482_s26, %s1990_s14  }
 0x304   : > { %s3592_s16 = scalar_lea.vmem [#allocation6], %s3472_s24  ;;  %s1994_s23 = scalar_lea.sflag [#allocation7], %s3472_s24 }
 0x305   : > { %1988 = vst [vmem:[%s3592_s16] sm:$0x1] %v1987_v8  ;;  %s2844_s21 = scalar_lea.vmem %s3492_s13, 16  ;;  %s2917_s25 = smov [#allocation6]  }
 0x306   : > { %p2845_p6 = scmp.ne.s32.totalorder %s3492_s13, %s2844_s21  ;;  %s2848_s22 = sshll.u32 %s2917_s25, 4  ;;  %s2849_s22 = int_to_ptr.vmem [resolvable:$false] %s2848_s22 }
 0x307   : > { %s2850_s27 = scalar_lea.vmem %s2849_s22, 32  ;;  %p2851_p9 = scmp.lt.s32.totalorder %s3492_s13, %s2849_s22 }
 0x308   : > { %p2846_p7 = pnand %p2845_p6, %p3004_p10  ;;  %p2852_p12 = scmp.lt.s32.totalorder %s2850_s27, %s2844_s21 }
 0x30a   : > { %p2847_p8 = pneg %p2846_p7  ;;  %p2853_p13 = por %p2852_p12, %p2851_p9 }
 0x30c   : > { %p2854_p0 = pnand %p2853_p13, %p2847_p8 }
 0x30e   : > { %2857 = shalt.err (!%p2854_p0)
}
 0x30f   : > { %s2858_s30 = scalar_lea.hbm %s3490_s9, 16  ;;  %s2862_s14 = scalar_lea.hbm %s3563_s8, 112 }
 0x310   : > { %p2859_p1 = scmp.ne.s32.totalorder %s3490_s9, %s2858_s30  ;;  %p2863_p4 = scmp.lt.s32.totalorder %s3490_s9, %s3563_s8 }
 0x311   : > { %p2864_p5 = scmp.lt.s32.totalorder %s2862_s14, %s2858_s30 }
 0x312   : > { %p2860_p2 = pnand %p2859_p1, %p3004_p10 }
 0x313   : > { %p2865_p6 = por %p2864_p5, %p2863_p4 }
 0x314   : > { %p2861_p3 = pneg %p2860_p2 }
 0x316   : > { %p2866_p7 = pnand %p2865_p6, %p2861_p3 }
 0x318   : > { %2869 = shalt.err (!%p2866_p7)
}
 0x319   : > { %2755 = dma.vmem_to_hbm [thread:$0]  (%p3004_p10), %s3492_s13, 16, %s3490_s9, %s1994_s23  }
 0x31a PF: > { %p2765_p8 = scmp.ge.s32.totalorder %s2910_s12, 2  ;;  %s2031_s17 = sand.u32 1, %s2898_s10  }
 0x31b   : > { %s2032_s16 = scalar_lea.sflag [#allocation5], %s2031_s17 }
 0x31c   : > { %p2759_p9 = pnand %p2765_p8, %p3008_p11 }
 0x31e   : > { %p2760_p12 = pneg %p2759_p9 }
 0x320   : > { %2889 = dma.done.wait (%p2760_p12), %s2032_s16, 16  }
 0x321   : > { %2891 = vsyncadd (%p2760_p12), %s2032_s16, 4294967280  ;;  %s2040_s21 = scalar_lea.sflag [#allocation7], %s2031_s17 }
 0x322   : > { %2893 = dma.done.wait (%p2760_p12), %s2040_s21, 16  }
 0x323   : > { %2895 = vsyncadd (%p2760_p12), %s2040_s21, 4294967280  ;;  %p28_p10 = scmp.ge.s32.totalorder %s2991_s15, 9   ;;  %s3593_s10 = smov %s2902_s0 }
 0x324   : > { %s3594_s0 = smov %s2906_s11  ;;  %s3595_s11 = smov %s3002_s18 }
 0x325   : > { %s3596_s12 = smov %s2991_s15  ;;  %30 = sbr.rel (!%p28_p10) target bundleno = 20 (0x14), region = 111 }
 0x32a   :  { %2044 = vsyncpa [#allocation5], 1 }
 0x32b   :  { %2046 = vsyncpa [#allocation5 + $0x1], 1 }
 0x32c   :  { %2047 = vsyncpa [#allocation7], 1 }
 0x32d   :  { %2049 = vsyncpa [#allocation7 + $0x1], 1 }

</bundles_post_ra>
